<compile_context>
chip_gen: v7x
topology: tpu7x:2x2x1
jax: 0.10.0
libtpu: 0.0.40
codegen_flags: <defaults>
</compile_context>

<pallas_src>
import math

import jax
import jax.numpy as jnp
from jax.experimental import pallas as pl
from jax.experimental.pallas import tpu as pltpu


# --------------------------------------------------------------------------
# Kernel: one 2-D MXU matmul + f32 positional add per grid step.
# --------------------------------------------------------------------------
def _data_embedding_kernel(x_ref, w_ref, pe_ref, o_ref):
    # x_ref : (block_rows, 3*c_in)    bf16  -- im2col'd input rows
    # w_ref : (3*c_in, d_model)       bf16  -- im2col conv weight (grid-invariant)
    # pe_ref: (block_rows, d_model)   f32   -- pre-tiled positional slab (grid-invariant)
    # o_ref : (block_rows, d_model)
    acc = jnp.dot(x_ref[...], w_ref[...], preferred_element_type=jnp.float32)
    o_ref[...] = (acc + pe_ref[...]).astype(o_ref.dtype)


# --------------------------------------------------------------------------
# Host-side helpers
# --------------------------------------------------------------------------
def _im2col(x):
    """Circular k=3 im2col along the sequence axis: (B, L, c) -> (B, L, 3c).

    Column order is [x[l-1] | x[l] | x[l+1]] with channels contiguous inside
    each tap, matching prepare_conv_weight's row order k*c_in + c.
    """
    x_prev = jnp.roll(x, 1, axis=1)    # x[l-1], circular
    x_next = jnp.roll(x, -1, axis=1)   # x[l+1], circular
    return jnp.concatenate([x_prev, x, x_next], axis=-1)


def prepare_conv_weight(conv_w):
    """conv_w: (d_model, c_in, 3) torch Conv1d layout -> (3*c_in, d_model) bf16.

    Row index is k*c_in + c (k=0 is the 'prev' tap), matching _im2col.  Done
    once, outside the per-call path.
    """
    d_model, c_in, K = conv_w.shape
    w = jnp.transpose(conv_w, (2, 1, 0)).reshape(K * c_in, d_model)
    return w.astype(jnp.bfloat16)


def _plan_tiling(B, L, c_in, d_model, out_itemsize, block_b=None):
    """Pick block_b (batch elems per grid step) + a matching VMEM limit.

    Sized for the HBM roofline (~6 MiB f32 output per tile), capped by a
    ~22 MiB per-step VMEM budget (safe inside v7x's 64 MiB physical VMEM) and
    by ceil(B/2) so >= 2 grid steps remain for v7x's dual TensorCores.
    """
    # Per-batch-element VMEM bytes per pipeline step (conservative):
    in_b = L * 3 * c_in * 2              # bf16 im2col rows, double-buffered
    out_b = L * d_model * out_itemsize   # output tile, double-buffered
    pe_b = L * d_model * 4               # resident positional slab
    acc_b = L * d_model * 4              # f32 matmul accumulator temp
    per_b = 2 * in_b + 2 * out_b + 2 * pe_b + acc_b

    if block_b is None:
        budget = 22 * 1024 * 1024
        vmem_cap = max(1, budget // per_b)
        # ~6 MiB of f32 output per tile amortizes the ~0.35us/step overhead.
        roofline_target = pl.cdiv(6 * 1024 * 1024, L * d_model * 4)
        block_b = max(1, min(roofline_target, vmem_cap))
        if B >= 2:
            block_b = min(block_b, pl.cdiv(B, 2))   # keep >= 2 grid steps
        block_b = min(block_b, B)
        # (8,128) rule on the row (sublane) dim: make block_rows a multiple of
        # 16 (safe for bf16 and f32 tiles) unless the block covers all rows.
        g = 16 // math.gcd(L, 16)
        if block_b < B:
            block_b = max(g, (block_b // g) * g)
            if block_b > B:
                block_b = B
    else:
        block_b = max(1, min(int(block_b), B))

    if block_b != B and (block_b * L) % 8 != 0:
        raise ValueError(
            f"block_b*L={block_b * L} must be a multiple of 8 (or block_b == B)")

    fixed = 2 * (3 * c_in * d_model * 2)            # double-buffered bf16 weight
    vmem_limit = per_b * block_b + fixed + 4 * 1024 * 1024
    vmem_limit = int(min(max(vmem_limit, 16 * 1024 * 1024), 32 * 1024 * 1024))
    return block_b, vmem_limit


def data_embedding(x, w_cat, pe, *, block_b=None, out_dtype=jnp.float32):
    """Fused TokenEmbedding (circular conv1d k=3, no bias) + PositionalEmbedding.

    x     : (B, L, c_in) f32
    w_cat : (3*c_in, d_model) bf16  (see prepare_conv_weight)
    pe    : (L, d_model) f32
    Set out_dtype=jnp.bfloat16 to halve the dominant HBM write if the
    downstream encoder accepts bf16 (semantics change vs the f32 module).
    """
    B, L, c_in = x.shape
    Kc, d_model = w_cat.shape
    assert Kc == 3 * c_in
    assert pe.shape == (L, d_model)

    out_itemsize = jnp.dtype(out_dtype).itemsize
    block_b, vmem_limit = _plan_tiling(B, L, c_in, d_model, out_itemsize, block_b)
    block_rows = block_b * L
    nrows = B * L
    grid = (pl.cdiv(nrows, block_rows),)

    # Wrapper-side (XLA) im2col + bf16 cast: removes all in-kernel relayouts.
    # Leading-dim reshape (B, L, 3c) -> (B*L, 3c) is a free row-major fold.
    x2d = _im2col(x).astype(jnp.bfloat16).reshape(nrows, Kc)

    # Pre-tiled positional slab: one output-tile-sized, grid-invariant input.
    pe_blk = jnp.tile(pe, (block_b, 1))                 # (block_rows, d_model) f32

    cost = pl.CostEstimate(
        flops=2 * nrows * Kc * d_model,
        transcendentals=0,
        bytes_accessed=(nrows * Kc * 2            # x2d read (bf16)
                        + Kc * d_model * 2        # weight read (bf16)
                        + block_rows * d_model * 4  # pe slab read (f32)
                        + nrows * d_model * out_itemsize))  # output write

    out2d = pl.pallas_call(
        _data_embedding_kernel,
        out_shape=jax.ShapeDtypeStruct((nrows, d_model), out_dtype),
        grid_spec=pltpu.PrefetchScalarGridSpec(
            num_scalar_prefetch=0,
            grid=grid,
            in_specs=[
                pl.BlockSpec((block_rows, Kc), lambda r: (r, 0)),
                # Grid-invariant operands (weight, pe slab): constant index maps.
                pl.BlockSpec((Kc, d_model), lambda r: (0, 0)),
                pl.BlockSpec((block_rows, d_model), lambda r: (0, 0)),
            ],
            out_specs=pl.BlockSpec((block_rows, d_model), lambda r: (r, 0)),
        ),
        compiler_params=pltpu.CompilerParams(
            dimension_semantics=("parallel",),
            vmem_limit_bytes=vmem_limit),
        cost_estimate=cost,
    )(x2d, w_cat, pe_blk)

    # Free leading-dim split back to the module's (B, L, d_model) layout.
    return out2d.reshape(B, L, d_model)


# --------------------------------------------------------------------------
# Parameter construction (matches the PyTorch module init)
# --------------------------------------------------------------------------
def make_positional_embedding(L, d_model):
    position = jnp.arange(L, dtype=jnp.float32)[:, None]                  # (L, 1)
    div_term = jnp.exp(jnp.arange(0, d_model, 2, dtype=jnp.float32)
                       * -(math.log(10000.0) / d_model))                  # (ceil(d/2),)
    pe = jnp.zeros((L, d_model), dtype=jnp.float32)
    pe = pe.at[:, 0::2].set(jnp.sin(position * div_term))
    pe = pe.at[:, 1::2].set(jnp.cos(position * div_term)[:, : d_model // 2])
    return pe


def make_conv_weight(key, c_in, d_model):
    # kaiming_normal_(mode='fan_in', nonlinearity='leaky_relu'):
    # gain = sqrt(2/(1+0.01^2)), fan_in = c_in * kernel_size
    fan_in = c_in * 3
    gain = math.sqrt(2.0 / (1.0 + 0.01 ** 2))
    std = gain / math.sqrt(fan_in)
    return std * jax.random.normal(key, (d_model, c_in, 3), dtype=jnp.float32)


# --------------------------------------------------------------------------
# References
# --------------------------------------------------------------------------
def reference_f32(x, conv_w, pe):
    """Faithful f32 math: circular conv1d(k=3, pad=1, no bias) + PE add."""
    B, L, c_in = x.shape
    d_model = conv_w.shape[0]
    w = jnp.transpose(conv_w, (2, 1, 0)).reshape(3 * c_in, d_model).astype(jnp.float32)
    out = jnp.einsum("blk,kd->bld", _im2col(x), w,
                     preferred_element_type=jnp.float32)
    return out + pe[None]


def reference_bf16(x, conv_w, pe):
    """Same numerics as the kernel (bf16 MXU operands, f32 accumulation)."""
    w = prepare_conv_weight(conv_w)
    xc = _im2col(x).astype(jnp.bfloat16)
    out = jnp.einsum("blk,kd->bld", xc, w, preferred_element_type=jnp.float32)
    return out + pe[None]


if __name__ == "__main__":
    key = jax.random.PRNGKey(0)
    kx, kw = jax.random.split(key)

    # Small demo shapes; d_model=128 keeps the output store lane-dense, and
    # B=8 exercises the batch tiling (block_b=4 -> 2 grid steps).
    B, L, c_in, d_model = 8, 16, 4, 128
    x = jax.random.normal(kx, (B, L, c_in), dtype=jnp.float32)
    conv_w = make_conv_weight(kw, c_in, d_model)       # torch layout (d_model, c_in, 3)
    pe = make_positional_embedding(L, d_model)
    w_cat = prepare_conv_weight(conv_w)                # staged once, bf16 (3*c_in, d_model)

    out = data_embedding(x, w_cat, pe)
    out = jax.block_until_ready(out)

    assert out.shape == (B, L, d_model)
    # Tight check against a JAX reference with identical numerics (bf16 MXU inputs).
    ref16 = reference_bf16(x, conv_w, pe)
    assert jnp.allclose(out, ref16, atol=1e-3, rtol=1e-3), \
        float(jnp.max(jnp.abs(out - ref16)))
    # Loose sanity check against the full-f32 module semantics.
    ref32 = reference_f32(x, conv_w, pe)
    assert jnp.allclose(out, ref32, atol=1e-1, rtol=5e-2), \
        float(jnp.max(jnp.abs(out - ref32)))
    print("KERNEL_OK")
</pallas_src>

<mosaic_0001>
module attributes {stable_mosaic.version = 11 : i64} {
  func.func @_data_embedding_kernel(%arg0: i32, %arg1: memref<64x12xbf16, #tpu.memory_space<vmem>>, %arg2: memref<12x128xbf16, #tpu.memory_space<vmem>>, %arg3: memref<64x128xf32, #tpu.memory_space<vmem>>, %arg4: memref<64x128xf32, #tpu.memory_space<vmem>>) attributes {dimension_semantics = [#tpu.dimension_semantics<parallel>], iteration_bounds = array<i64: 2>, scalar_prefetch = 0 : i64, scratch_operands = 0 : i64, tpu.core_type = #tpu.core_type<tc>, window_params = [{transform_indices = @transform_0, window_bounds = array<i64: 64, 12>}, {pipeline_mode = #tpu.pipeline_mode<synchronous>, transform_indices = @transform_1, window_bounds = array<i64: 12, 128>}, {pipeline_mode = #tpu.pipeline_mode<synchronous>, transform_indices = @transform_2, window_bounds = array<i64: 64, 128>}, {transform_indices = @transform_3, window_bounds = array<i64: 64, 128>}]} {
    %c0 = arith.constant 0 : index
    %c0_0 = arith.constant 0 : index
    %0 = vector.load %arg1[%c0, %c0_0] : memref<64x12xbf16, #tpu.memory_space<vmem>>, vector<64x12xbf16>
    %c0_1 = arith.constant 0 : index
    %c0_2 = arith.constant 0 : index
    %1 = vector.load %arg2[%c0_1, %c0_2] : memref<12x128xbf16, #tpu.memory_space<vmem>>, vector<12x128xbf16>
    %cst = arith.constant dense<0.000000e+00> : vector<64x128xf32>
    %2 = tpu.matmul %0, %1, %cst {dimension_numbers = #tpu.dot_dimension_numbers<[1], [0], [0], [1], [0, 0, 1, 1], [], []>} : vector<64x12xbf16>, vector<12x128xbf16>, vector<64x128xf32> -> vector<64x128xf32>
    %c0_3 = arith.constant 0 : index
    %c0_4 = arith.constant 0 : index
    %3 = vector.load %arg3[%c0_3, %c0_4] : memref<64x128xf32, #tpu.memory_space<vmem>>, vector<64x128xf32>
    %4 = arith.addf %2, %3 : vector<64x128xf32>
    %c0_5 = arith.constant 0 : index
    %c0_6 = arith.constant 0 : index
    %5 = vector.load %arg4[%c0_5, %c0_6] : memref<64x128xf32, #tpu.memory_space<vmem>>, vector<64x128xf32>
    tpu.vector_store %arg4[%c0_5, %c0_6], %4 {strides = array<i32>} : memref<64x128xf32, #tpu.memory_space<vmem>>, vector<64x128xf32>,
    return
  }
  func.func @transform_0(%arg0: i32) -> (i32, i32) {
    %c0_i32 = arith.constant 0 : i32
    %c0_i32_0 = arith.constant 0 : i32
    return %arg0, %c0_i32 : i32, i32
  }
  func.func @transform_1(%arg0: i32) -> (i32, i32) {
    %c0_i32 = arith.constant 0 : i32
    %c0_i32_0 = arith.constant 0 : i32
    %c0_i32_1 = arith.constant 0 : i32
    return %c0_i32, %c0_i32_0 : i32, i32
  }
  func.func @transform_2(%arg0: i32) -> (i32, i32) {
    %c0_i32 = arith.constant 0 : i32
    %c0_i32_0 = arith.constant 0 : i32
    %c0_i32_1 = arith.constant 0 : i32
    return %c0_i32, %c0_i32_0 : i32, i32
  }
  func.func @transform_3(%arg0: i32) -> (i32, i32) {
    %c0_i32 = arith.constant 0 : i32
    %c0_i32_0 = arith.constant 0 : i32
    return %arg0, %c0_i32 : i32, i32
  }
}

</mosaic_0001>

<bundles_post_ra>
// kernel: tpu_custom_call.1
= control target key start
LH: loop header
LB: loop body
LE: loop exit
PB: predicated region body
PF: predicated region fallthrough
CT: control target
= control target key end

     0   :  { %8 = vsyncpa [#allocation3], 0  ;;  %s689_s0 = inlined_call_operand.vmem [shape: bf16[128,12], index: 0, kind: input, shape index: {}]   ;;  %s690_s1 = inlined_call_operand.vmem [shape: bf16[12,128], index: 1, kind: input, shape index: {}]   ;;  %s691_s2 = inlined_call_operand.vmem [shape: f32[64,128], index: 2, kind: input, shape index: {}]   ;;  %s692_s3 = inlined_call_operand.hbm [shape: f32[128,128], index: 3, kind: output, shape index: {}]  }
   0x1   :  { %10 = vsyncpa [#allocation3 + $0x1], 0  ;;  %s556_s12 = smov 0   ;;  %s558_s13 = smov 0  }
   0x2   :  { %s560_s14 = smov 0   ;;  %s562_s15 = smov 0  }
   0x3 LB: > { %s577_s16 = sadd.s32 4294967295, %s531_s15   ;;  %s382_s17 = sadd.s32 4294967294, %s531_s15   ;;  %s531_s15 = sphi %s562_s15, %s698_s15   ;;  %s527_s14 = sphi %s560_s14, %s697_s14   ;;  %s523_s13 = sphi %s558_s13, %s696_s13   ;;  %s519_s12 = sphi %s556_s12, %s695_s12  }
   0x4   : > { %s581_s18 = sadd.s32 1, %s531_s15   ;;  %s91_s19 = sadd.s32 1, %s527_s14 }
   0x5   : > { %s88_s20 = ssub.s32 %s531_s15, %s581_s18  ;;  %p101_p0 = scmp.ne.s32.totalorder %s527_s14, %s523_s13 }
   0x6   : > { %p89_p1 = scmp.eq.s32.totalorder %s88_s20, 0  ;;  %p102_p2 = scmp.eq.s32.totalorder %s577_s16, 1 }
   0x7   : > { %p107_p3 = scmp.ne.s32.totalorder %s523_s13, %s519_s12  ;;  %p108_p4 = scmp.eq.s32.totalorder %s382_s17, 1 }
   0x8   : > { %s592_s21 = scalar_select %p89_p1, %s527_s14, %s91_s19  }
   0x9   : > { %p594_p5 = por %p102_p2, %p101_p0  ;;  %p598_p6 = por %p108_p4, %p107_p3 }
   0xa   : > { %p385_p7 = scmp.ge.s32.totalorder %s531_s15, 1  ;;  %p141_p8 = scmp.lt.s32.totalorder %s531_s15, 3 }
   0xc   : > { %p142_p9 = pnand %p385_p7, %p141_p8 }
   0xd   : > { %v464_v0 = vld [vmem:[%s690_s1] sm:$0x3f] (!%p142_p9)   ;;  %vm229_vm0 = vcmask (!%p142_p9), 1045504   ;;  %s387_s26 = sshll.u32 (!%p142_p9), %s577_s16, 3  ;;  %vm216_vm1 = vcmask (!%p142_p9), 97280   ;;  %s162_s4 = sand.u32 (!%p142_p9), 1, %s523_s13  }
   0xe   : > { %145 = sbr.rel (%p142_p9) target bundleno = 258 (0x102), region = 32  ;;  %421 = vmatprep.subr.msk.bf16.mxu0 (!%p142_p9), %vm229_vm0, %v464_v0  ;;  %422 = vmatprep.subr.msk.bf16.mxu1 (!%p142_p9), %vm229_vm0, %v464_v0  ;;  %v231_v1 = vsel (!%p142_p9), %vm229_vm0, %v464_v0, 0  ;;  %p166_p10 = scmp.lt.s32.totalorder (!%p142_p9), %s387_s26, 15  ;;  %v185_v6 = vld [vmem:[%s691_s2 + $0x10] sm:$0xff] (!%p142_p9)  ;;  %v183_v8 = vld [vmem:[%s691_s2] sm:$0xff] (!%p142_p9)  ;;  %v186_v11 = vld [vmem:[%s691_s2 + $0x18] sm:$0xff] (!%p142_p9) }
   0xf   : > { %410 = vmatpush3.bf16.msra.mxu0 (!%p142_p9), %v231_v1  ;;  %420 = vmatpush3.bf16.msra.mxu1 (!%p142_p9), %v231_v1  ;;  %s386_s5 = sshll.u32 (!%p142_p9), %s162_s4, 6  ;;  %v189_v7 = vld [vmem:[%s691_s2 + $0x30] sm:$0xff] (!%p142_p9)  ;;  %v187_v10 = vld [vmem:[%s691_s2 + $0x20] sm:$0xff] (!%p142_p9)  ;;  %v190_v15 = vld [vmem:[%s691_s2 + $0x38] sm:$0xff] (!%p142_p9)  ;;  %s403_s29 = sshll.u32 (!%p142_p9), %s577_s16, 10 }
  0x10   : > { %v184_v16 = vld [vmem:[%s691_s2 + $0x8] sm:$0xff] (!%p142_p9)  ;;  %s642_s9 = scalar_lea.hbm (!%p142_p9), %s692_s3, %s403_s29  ;;  %s648_s10 = scalar_lea.sflag (!%p142_p9), [#allocation3], %s162_s4 }
  0x11   : > { %v188_v21 = vld [vmem:[%s691_s2 + $0x28] sm:$0xff] (!%p142_p9)  ;;  %s533_s17 = smov (!%p142_p9), [#allocation2]  }
  0x12   : > { %s473_s19 = sshll.u32 (!%p142_p9), %s533_s17, 4  ;;  %s474_s19 = int_to_ptr.vmem [resolvable:$false] %s473_s19 }
  0x13   : > { %s475_s20 = scalar_lea.vmem (!%p142_p9), %s474_s19, 2048 }
  0x15   : > { %s700_s26 = smov (!%p166_p10, %s387_s26), 15 }
  0x16   : > { %s388_s27 = sshll.u32 %s700_s26, 2 }
  0x17   : > { %s169_s30 = scalar_lea.vmem %s689_s0, %s388_s27 }
  0x18   : > { %v465_v2 = vld [vmem:[%s169_s30] sm:$0xff]   ;;  %v466_v3 = vld [vmem:[%s169_s30 + $0x10] sm:$0xff]   ;;  %v467_v4 = vld [vmem:[%s169_s30 + $0x8] sm:$0xff]  }
  0x19   : > { %411 = vmatprep.mubr.msk.bf16.mxu0 %vm216_vm1, %v465_v2  ;;  %415 = vmatprep.mubr.msk.bf16.mxu1 %vm216_vm1, %v466_v3  ;;  %v468_v5 = vld [vmem:[%s169_s30 + $0x18] sm:$0xff]   ;;  %s164_s30 = scalar_lea.vmem [#allocation2], %s386_s5 }
  0x1a   : > { %412 = vmatmul.mubr.msk.bf16.vlgmr.msra.gmra.mrb[0].mxu0 %vm216_vm1, %v467_v4  ;;  %416 = vmatmul.mubr.msk.bf16.vlgmr.msra.gmra.mrb[0].mxu1 %vm216_vm1, %v468_v5  ;;  %s320_s6 = sshll.u32 %s164_s30, 4  ;;  %s644_s6 = int_to_ptr.vmem [resolvable:$true] %s320_s6 }
  0x1b   : > { %s469_s11 = scalar_lea.vmem %s644_s6, 1024  ;;  %p476_p0 = scmp.lt.s32.totalorder %s644_s6, %s474_s19 }
  0x1c   : > { %p470_p11 = scmp.ne.s32.totalorder %s644_s6, %s469_s11  ;;  %p477_p1 = scmp.lt.s32.totalorder %s475_s20, %s469_s11 }
  0x1e   : > { %p471_p12 = pnand %p470_p11, %p594_p5  ;;  %p478_p2 = por %p477_p1, %p476_p0 }
  0x20   : > { %p472_p13 = pneg %p471_p12 }
  0x22   : > { %p479_p3 = pnand %p478_p2, %p472_p13 }
  0xed   : > { %v413_v9 = vpop.f32.mrb[0].mxu0  ;;  %v417_v13 = vpop.f32.mrb[0].mxu1 }
  0xee   : > { %v276_v12 = vadd.f32 %v413_v9, %v185_v6  ;;  %v267_v14 = vpop.f32.mrb[1].mxu0  ;;  %v292_v17 = vadd.f32 %v417_v13, %v189_v7  ;;  %v283_v19 = vpop.f32.mrb[1].mxu1 }
  0xef   : > { %v268_v18 = vadd.f32 %v267_v14, %v183_v8  ;;  %v414_v20 = vpop.f32.mrb[2].mxu0  ;;  %v284_v22 = vadd.f32 %v283_v19, %v187_v10  ;;  %v418_v24 = vpop.f32.mrb[2].mxu1 }
  0xf0   : > { %300 = vst [vmem:[%s164_s30 + $0x10] sm:$0xff] %v276_v12  ;;  %v279_v23 = vadd.f32 %v414_v20, %v186_v11  ;;  %v270_v25 = vpop.f32.mrb[3].mxu0  ;;  %304 = vst [vmem:[%s164_s30 + $0x30] sm:$0xff] %v292_v17  ;;  %v295_v26 = vadd.f32 %v418_v24, %v190_v15  ;;  %v286_v28 = vpop.f32.mrb[3].mxu1 }
  0xf1   : > { %298 = vst [vmem:[%s164_s30] sm:$0xff] %v268_v18  ;;  %v271_v27 = vadd.f32 %v270_v25, %v184_v16  ;;  %302 = vst [vmem:[%s164_s30 + $0x20] sm:$0xff] %v284_v22  ;;  %v287_v29 = vadd.f32 %v286_v28, %v188_v21 }
  0xf2   : > { %301 = vst [vmem:[%s164_s30 + $0x18] sm:$0xff] %v279_v23  ;;  %305 = vst [vmem:[%s164_s30 + $0x38] sm:$0xff] %v295_v26 }
  0xf3   : > { %299 = vst [vmem:[%s164_s30 + $0x8] sm:$0xff] %v271_v27  ;;  %303 = vst [vmem:[%s164_s30 + $0x28] sm:$0xff] %v287_v29 }
  0xf4   : > { %482 = shalt.err (!%p479_p3)
}
  0xf5   : > { %s483_s4 = scalar_lea.hbm %s642_s9, 1024  ;;  %s487_s26 = scalar_lea.hbm %s692_s3, 2048 }
  0xf6   : > { %p484_p4 = scmp.ne.s32.totalorder %s642_s9, %s483_s4  ;;  %p488_p9 = scmp.lt.u32.totalorder %s642_s9, %s692_s3 }
  0xf7   : > { %p489_p10 = scmp.lt.u32.totalorder %s487_s26, %s483_s4  ;;  %p491_p12 = scmp.lt.u32.totalorder %s483_s4, %s642_s9 }
  0xf8   : > { %p485_p7 = pnand %p484_p4, %p594_p5 }
  0xf9   : > { %p490_p11 = por %p489_p10, %p488_p9 }
  0xfa   : > { %p486_p8 = pneg %p485_p7 }
  0xfb   : > { %p492_p13 = por %p491_p12, %p490_p11 }
  0xfd   : > { %p493_p0 = pnand %p492_p13, %p486_p8 }
  0xff   : > { %496 = shalt.err (!%p493_p0)
}
 0x100   : > { %s534_s29 = smov 128   ;;  %s535_s30 = smov 8  }
 0x101   : > { %423 = dma.vmem_to_hbm [thread:$0]  (%p594_p5), %s644_s6, 1024, %s642_s9, %s648_s10, %s534_s29, %s534_s29, %s535_s30  }
 0x102 PF: > { %p429_p1 = scmp.ge.s32.totalorder %s531_s15, 2  ;;  %s335_s7 = sand.u32 1, %s519_s12  }
 0x103   : > { %s336_s8 = scalar_lea.sflag [#allocation3], %s335_s7 }
 0x104   : > { %p426_p2 = pnand %p429_p1, %p598_p6 }
 0x106   : > { %514 = dma.done.wait (!%p426_p2), %s336_s8, 1024  }
 0x107   : > { %516 = vsyncadd (!%p426_p2), %s336_s8, 4294966272  ;;  %p13_p3 = scmp.ge.s32.totalorder %s581_s18, 4   ;;  %s695_s12 = smov %s523_s13 }
 0x108   : > { %s696_s13 = smov %s527_s14  ;;  %s697_s14 = smov %s592_s21 }
 0x109   : > { %s698_s15 = smov %s581_s18  ;;  %15 = sbr.rel (!%p13_p3) target bundleno = 3 (0x3), region = 67 }
 0x110   :  { %341 = vsyncpa [#allocation3], 1 }
 0x111   :  { %343 = vsyncpa [#allocation3 + $0x1], 1 }

</bundles_post_ra>
